<compile_context>
chip_gen: v5e
topology: v5e:2x2
jax: 0.10.0
libtpu: 0.0.40
codegen_flags: <defaults>
</compile_context>

<pallas_src>
import functools

import jax
import jax.numpy as jnp
from jax.experimental import pallas as pl
from jax.experimental.pallas import tpu as pltpu

NUM_INPUTS = 23
NUM_HIDDEN = 10
NUM_OUTPUTS = 96

HID_PAD = 128   # hidden dim padded to one full lane width
OUT_PAD = 128   # output dim padded to one full lane width (sliced to 96 in wrapper)


def mlp_kernel(x_ref, w1_ref, b1_ref, w2_ref, b2_ref, o_ref):
    # Cast x f32 -> bf16 in-kernel (VPU, free under the pipeline); avoids a separate
    # XLA convert pass over HBM in the wrapper.
    x = x_ref[...].astype(jnp.bfloat16)
    # fc1: bf16 x bf16 -> f32 accumulate on the MXU
    h = jnp.dot(x, w1_ref[...], preferred_element_type=jnp.float32)
    # bias + ReLU in f32 on the VPU (padded hidden lanes stay exactly 0)
    h = jnp.maximum(h + b1_ref[...], 0.0)
    # fc2: cast hidden back to bf16 for a single MXU pass, accumulate f32
    y = jnp.dot(h.astype(jnp.bfloat16), w2_ref[...],
                preferred_element_type=jnp.float32)
    o_ref[...] = (y + b2_ref[...]).astype(o_ref.dtype)


def prepare_params(w1_t, b1_t, w2_t, b2_t):
    """One-time prep: transpose PyTorch (out,in) weights to (in,out), zero-pad the
    feature (lane) dims to 128, and cast matmul operands to bf16."""
    w1 = jnp.zeros((NUM_INPUTS, HID_PAD), jnp.bfloat16)
    w1 = w1.at[:, :NUM_HIDDEN].set(w1_t.T.astype(jnp.bfloat16))
    b1 = jnp.zeros((1, HID_PAD), jnp.float32).at[:, :NUM_HIDDEN].set(b1_t[None, :])
    w2 = jnp.zeros((HID_PAD, OUT_PAD), jnp.bfloat16)
    w2 = w2.at[:NUM_HIDDEN, :NUM_OUTPUTS].set(w2_t.T.astype(jnp.bfloat16))
    b2 = jnp.zeros((1, OUT_PAD), jnp.float32).at[:, :NUM_OUTPUTS].set(b2_t[None, :])
    return w1, b1, w2, b2


def _weight_vmem_bytes():
    return (NUM_INPUTS * HID_PAD * 2 + HID_PAD * 4
            + HID_PAD * OUT_PAD * 2 + OUT_PAD * 4)


@functools.partial(jax.jit, static_argnames=("batch_tile", "return_padded"))
def neural_net_forward(x, w1, b1, w2, b2, *, batch_tile=None, return_padded=False):
    """x: (B, 23) f32 -> (B, 96) f32 (or (B, 128) f32 slab if return_padded=True).
    w1/b1/w2/b2 as produced by prepare_params.

    batch_tile=None  -> single invocation, no grid (best for small/medium B).
    batch_tile=TB    -> batch-tiled grid with a "parallel" axis (use for large B).
                        TB must divide B exactly (pad B upstream, once, in the data
                        pipeline) and be a multiple of 8 (16 recommended). Prefer
                        large tiles (2048-8192): per-row VMEM is ~1.2 KB
                        double-buffered, so even TB=8192 (~10 MiB) fits every
                        generation; overhead amortization, not VMEM, is the limit.
                        The parallel grid is also what engages both v7x TensorCores.

    return_padded=True returns the lane-dense (B, 128) slab (lanes 96..127 are
    exactly 0) so a consumer can fuse/skip the [:, :96] slice pass.
    """
    B = x.shape[0]

    if batch_tile is None:
        out = pl.pallas_call(
            mlp_kernel,
            out_shape=jax.ShapeDtypeStruct((B, OUT_PAD), jnp.float32),
            in_specs=[pl.BlockSpec(memory_space=pltpu.MemorySpace.VMEM)] * 5,
            out_specs=pl.BlockSpec(memory_space=pltpu.MemorySpace.VMEM),
        )(x, w1, b1, w2, b2)
        return out if return_padded else out[:, :NUM_OUTPUTS]

    # ---- batch-tiled path ----
    tb = int(batch_tile)
    if tb % 8 != 0:
        raise ValueError(f"batch_tile must be a multiple of 8, got {tb}")
    if B % tb != 0:
        raise ValueError(
            f"batch_tile={tb} must divide B={B} exactly; pad the batch once upstream "
            "or use batch_tile=None")
    n_tiles = B // tb

    # Double-buffered x tile (f32) + out tile (f32) + resident weights, plus headroom.
    vmem_bytes = 2 * tb * (NUM_INPUTS * 4 + OUT_PAD * 4) + _weight_vmem_bytes()
    vmem_bytes = max(vmem_bytes + (2 << 20), 16 << 20)

    out = pl.pallas_call(
        mlp_kernel,
        out_shape=jax.ShapeDtypeStruct((B, OUT_PAD), jnp.float32),
        grid_spec=pl.GridSpec(
            grid=(n_tiles,),
            in_specs=[
                pl.BlockSpec((tb, NUM_INPUTS), lambda i: (i, 0)),
                pl.BlockSpec((NUM_INPUTS, HID_PAD), lambda i: (0, 0)),
                pl.BlockSpec((1, HID_PAD), lambda i: (0, 0)),
                pl.BlockSpec((HID_PAD, OUT_PAD), lambda i: (0, 0)),
                pl.BlockSpec((1, OUT_PAD), lambda i: (0, 0)),
            ],
            out_specs=pl.BlockSpec((tb, OUT_PAD), lambda i: (i, 0)),
        ),
        compiler_params=pltpu.CompilerParams(
            dimension_semantics=("parallel",),
            vmem_limit_bytes=int(vmem_bytes),
        ),
    )(x, w1, b1, w2, b2)
    return out if return_padded else out[:, :NUM_OUTPUTS]


def init_params(key):
    """Deterministic init matching nn.Linear shapes (PyTorch (out,in) layout)."""
    k1, k2, k3, k4 = jax.random.split(key, 4)
    bound1 = 1.0 / jnp.sqrt(NUM_INPUTS)
    bound2 = 1.0 / jnp.sqrt(NUM_HIDDEN)
    w1 = jax.random.uniform(k1, (NUM_HIDDEN, NUM_INPUTS), jnp.float32, -bound1, bound1)
    b1 = jax.random.uniform(k2, (NUM_HIDDEN,), jnp.float32, -bound1, bound1)
    w2 = jax.random.uniform(k3, (NUM_OUTPUTS, NUM_HIDDEN), jnp.float32, -bound2, bound2)
    b2 = jax.random.uniform(k4, (NUM_OUTPUTS,), jnp.float32, -bound2, bound2)
    return w1, b1, w2, b2


def reference_forward_bf16(x, w1_t, b1_t, w2_t, b2_t):
    """Reference with the same bf16-operand / f32-accumulate numerics as the kernel."""
    h = jnp.dot(x.astype(jnp.bfloat16), w1_t.T.astype(jnp.bfloat16),
                preferred_element_type=jnp.float32) + b1_t[None, :]
    h = jnp.maximum(h, 0.0)
    return jnp.dot(h.astype(jnp.bfloat16), w2_t.T.astype(jnp.bfloat16),
                   preferred_element_type=jnp.float32) + b2_t[None, :]


def reference_forward_f32(x, w1_t, b1_t, w2_t, b2_t):
    h = jnp.maximum(x @ w1_t.T + b1_t[None, :], 0.0)
    return h @ w2_t.T + b2_t[None, :]


if __name__ == "__main__":
    key = jax.random.PRNGKey(0)
    kx, kp = jax.random.split(key)

    batch = 32  # module's self.batch_size
    x = jax.random.normal(kx, (batch, NUM_INPUTS), jnp.float32)
    torch_params = init_params(kp)
    packed = prepare_params(*torch_params)

    # Small-batch (grid-less) path.
    out = jax.block_until_ready(neural_net_forward(x, *packed))
    assert out.shape == (batch, NUM_OUTPUTS)
    ref_bf16 = reference_forward_bf16(x, *torch_params)
    ref_f32 = reference_forward_f32(x, *torch_params)
    assert jnp.allclose(out, ref_bf16, atol=2e-3, rtol=2e-3)
    assert jnp.allclose(out, ref_f32, atol=2e-2, rtol=2e-2)

    # Padded-slab variant (fusion-friendly consumer path): lanes 96..127 are zero.
    out_pad = jax.block_until_ready(neural_net_forward(x, *packed, return_padded=True))
    assert out_pad.shape == (batch, OUT_PAD)
    assert jnp.allclose(out_pad[:, :NUM_OUTPUTS], out)
    assert jnp.all(out_pad[:, NUM_OUTPUTS:] == 0.0)

    # Batch-tiled "parallel" path (tile divides B exactly, multiple of 16; no pad).
    x_big = jax.random.normal(kx, (512, NUM_INPUTS), jnp.float32)
    out_big = jax.block_until_ready(
        neural_net_forward(x_big, *packed, batch_tile=128))
    assert out_big.shape == (512, NUM_OUTPUTS)
    assert jnp.allclose(out_big, reference_forward_bf16(x_big, *torch_params),
                        atol=2e-3, rtol=2e-3)

    print("KERNEL_OK")
</pallas_src>

<mosaic_0001>
module attributes {stable_mosaic.version = 11 : i64} {
  func.func @mlp_kernel(%arg0: memref<32x23xf32, #tpu.memory_space<vmem>>, %arg1: memref<23x128xbf16, #tpu.memory_space<vmem>>, %arg2: memref<1x128xf32, #tpu.memory_space<vmem>>, %arg3: memref<128x128xbf16, #tpu.memory_space<vmem>>, %arg4: memref<1x128xf32, #tpu.memory_space<vmem>>, %arg5: memref<32x128xf32, #tpu.memory_space<vmem>>) attributes {dimension_semantics = [], scalar_prefetch = 0 : i64, scratch_operands = 0 : i64, tpu.core_type = #tpu.core_type<tc>} {
    %c0 = arith.constant 0 : index
    %c0_0 = arith.constant 0 : index
    %0 = vector.load %arg0[%c0, %c0_0] : memref<32x23xf32, #tpu.memory_space<vmem>>, vector<32x23xf32>
    %1 = arith.truncf %0 : vector<32x23xf32> to vector<32x23xbf16>
    %c0_1 = arith.constant 0 : index
    %c0_2 = arith.constant 0 : index
    %2 = vector.load %arg1[%c0_1, %c0_2] : memref<23x128xbf16, #tpu.memory_space<vmem>>, vector<23x128xbf16>
    %cst = arith.constant dense<0.000000e+00> : vector<32x128xf32>
    %3 = tpu.matmul %1, %2, %cst {dimension_numbers = #tpu.dot_dimension_numbers<[1], [0], [0], [1], [0, 0, 1, 1], [], []>} : vector<32x23xbf16>, vector<23x128xbf16>, vector<32x128xf32> -> vector<32x128xf32>
    %c0_3 = arith.constant 0 : index
    %c0_4 = arith.constant 0 : index
    %4 = vector.load %arg2[%c0_3, %c0_4] : memref<1x128xf32, #tpu.memory_space<vmem>>, vector<1x128xf32>
    %5 = vector.broadcast %4 : vector<1x128xf32> to vector<32x128xf32>
    %6 = arith.addf %3, %5 : vector<32x128xf32>
    %cst_5 = arith.constant 0.000000e+00 : f32
    %7 = vector.broadcast %cst_5 : f32 to vector<32x128xf32>
    %8 = arith.maximumf %6, %7 : vector<32x128xf32>
    %9 = arith.truncf %8 : vector<32x128xf32> to vector<32x128xbf16>
    %c0_6 = arith.constant 0 : index
    %c0_7 = arith.constant 0 : index
    %10 = vector.load %arg3[%c0_6, %c0_7] : memref<128x128xbf16, #tpu.memory_space<vmem>>, vector<128x128xbf16>
    %cst_8 = arith.constant dense<0.000000e+00> : vector<32x128xf32>
    %11 = tpu.matmul %9, %10, %cst_8 {dimension_numbers = #tpu.dot_dimension_numbers<[1], [0], [0], [1], [0, 0, 1, 1], [], []>} : vector<32x128xbf16>, vector<128x128xbf16>, vector<32x128xf32> -> vector<32x128xf32>
    %c0_9 = arith.constant 0 : index
    %c0_10 = arith.constant 0 : index
    %12 = vector.load %arg4[%c0_9, %c0_10] : memref<1x128xf32, #tpu.memory_space<vmem>>, vector<1x128xf32>
    %13 = vector.broadcast %12 : vector<1x128xf32> to vector<32x128xf32>
    %14 = arith.addf %11, %13 : vector<32x128xf32>
    %c0_11 = arith.constant 0 : index
    %c0_12 = arith.constant 0 : index
    %15 = vector.load %arg5[%c0_11, %c0_12] : memref<32x128xf32, #tpu.memory_space<vmem>>, vector<32x128xf32>
    tpu.vector_store %arg5[%c0_11, %c0_12], %14 {strides = array<i32>} : memref<32x128xf32, #tpu.memory_space<vmem>>, vector<32x128xf32>,
    return
  }
}

</mosaic_0001>

<bundles_post_ra>
// kernel: neural_net_forward.1
= control target key start
LH: loop header
LB: loop body
LE: loop exit
PB: predicated region body
PF: predicated region fallthrough
CT: control target
= control target key end

     0   :  { %10 = vsyncpa [#allocation3], 0  ;;  %s392_s0 = inlined_call_operand.vmem [shape: f32[32,23], index: 0, kind: input, shape index: {}]   ;;  %s393_s1 = inlined_call_operand.vmem [shape: bf16[23,128], index: 1, kind: input, shape index: {}]   ;;  %s394_s2 = inlined_call_operand.vmem [shape: f32[1,128], index: 2, kind: input, shape index: {}]   ;;  %s395_s3 = inlined_call_operand.hbm [shape: bf16[128,128], index: 3, kind: input, shape index: {}]   ;;  %s396_s4 = inlined_call_operand.vmem [shape: f32[1,128], index: 4, kind: input, shape index: {}]   ;;  %s397_s5 = inlined_call_operand.hbm [shape: f32[32,128], index: 5, kind: output, shape index: {}]  }
   0x1   :  { %11 = vsyncpa [#allocation4], 0  ;;  %s22_s20 = sshll.u32 %s395_s3, 4  ;;  %s325_s21 = smov [#allocation2]   ;;  %s23_s20 = int_to_ptr.hbm [resolvable:$true] %s22_s20 }
   0x2   :  { %s24_s22 = sshll.u32 %s325_s21, 4  ;;  %s326_s23 = smov 64   ;;  %s25_s22 = int_to_ptr.vmem [resolvable:$true] %s24_s22 }
   0x3   :  { %s327_s24 = smov 4  }
   0x4   :  { %30 = dma.hbm_to_vmem [thread:$0]  %s23_s20, 1024, %s25_s22, [#allocation3], %s326_s23, %s326_s23, %s327_s24  }
   0x5   :  { %321 = dma.done.wait [#allocation3], 1024  }
   0x6   :  { %322 = vsyncadd [#allocation3], 4294966272  ;;  %vm67_vm0 = vcmask 1042432   ;;  %vm68_vm1 = vcmask 1043456   ;;  %v328_v0 = vmov 65535   ;;  %v255_v5 = vld [vmem:[#allocation2 + $0x38] sm:$0xff] }
   0x7   :  { %v69_v1 = vsel %vm67_vm0, 4294967295, %v328_v0  ;;  %v46_v2 = vld [vmem:[%s393_s1 + $0x8] sm:$0xf]  ;;  %167 = vmatpush.bf16.msra.mxu1 %v255_v5  ;;  %v254_v7 = vld [vmem:[#allocation2 + $0x30] sm:$0xff]  ;;  %256 = vmatpush.bf16.msra.mxu2 %v255_v5  ;;  %v247_v9 = vld [vmem:[%s393_s1] sm:$0xff]  ;;  %vm60_vm2 = vcmask 187392  }
   0x8   :  { %v56_v3 = vunpack.c.l.b16 %v46_v2  ;;  %v70_v4 = vsel %vm68_vm1, %v69_v1, 0  ;;  %v38_v10 = vld [vmem:[%s392_s0] sm:$0xff]  ;;  %v39_v11 = vld [vmem:[%s392_s0 + $0x8] sm:$0xff]  ;;  %v40_v15 = vld [vmem:[%s392_s0 + $0x10] sm:$0xff]  ;;  %s196_s16 = sshll.u32 %s397_s5, 4  ;;  %s331_s17 = smov 8   ;;  %s197_s16 = int_to_ptr.hbm [resolvable:$true] %s196_s16 }
   0x9   :  { %v253_v12 = vld [vmem:[#allocation2 + $0x28] sm:$0xff]  ;;  %v42_v13 = vpack.c.bf16 %v39_v11, %v38_v10  ;;  %v252_v14 = vld [vmem:[#allocation2 + $0x20] sm:$0xff]  ;;  %v41_v16 = vld [vmem:[%s392_s0 + $0x18] sm:$0xff] }
   0xa   :  { %v58_v6 = vpack.c.b16 %v56_v3, %v56_v3  ;;  %v43_v17 = vpack.c.bf16 %v41_v16, %v40_v15  ;;  %v251_v18 = vld [vmem:[#allocation2 + $0x18] sm:$0xff]  ;;  %v250_v19 = vld [vmem:[#allocation2 + $0x10] sm:$0xff]  ;;  %v249_v20 = vld [vmem:[#allocation2 + $0x8] sm:$0xff] }
   0xb   :  { %168 = vmatpush.bf16.msra.mxu1 %v254_v7  ;;  %257 = vmatpush.bf16.msra.mxu2 %v254_v7  ;;  %v248_v21 = vld [vmem:[#allocation2] sm:$0xff] }
   0xc   :  { %v72_v8 = vand.u32 %v70_v4, %v58_v6  ;;  %v271_v23 = vld [vmem:[%s394_s2] ss:$0 sm:$0xff]  ;;  %s329_s2 = smov [#allocation5]  }
   0xd   :  { %v272_v37 = vld [vmem:[%s396_s4] ss:$0 sm:$0xff]  ;;  %s194_s13 = sshll.u32 %s329_s2, 4  ;;  %s330_s4 = smov 128   ;;  %s195_s13 = int_to_ptr.vmem [resolvable:$true] %s194_s13 }
   0xe   :  { %80 = vmatpush.bf16.msra.mxu0 %v72_v8 }
   0xf   :  { %169 = vmatpush.bf16.msra.mxu1 %v253_v12  ;;  %258 = vmatpush.bf16.msra.mxu2 %v253_v12 }
  0x12   :  { %81 = vmatpush.bf16.msra.mxu0 %v247_v9 }
  0x13   :  { %170 = vmatpush.bf16.msra.mxu1 %v252_v14  ;;  %259 = vmatpush.bf16.msra.mxu2 %v252_v14 }
  0x15   :  { %213 = vmatmul.msk.bf16.vlgmr.msra.gmra.mxu0 %vm60_vm2, %v42_v13 }
  0x17   :  { %171 = vmatpush.bf16.msra.mxu1 %v251_v18  ;;  %260 = vmatpush.bf16.msra.mxu2 %v251_v18 }
  0x1b   :  { %172 = vmatpush.bf16.msra.mxu1 %v250_v19  ;;  %261 = vmatpush.bf16.msra.mxu2 %v250_v19 }
  0x1f   :  { %173 = vmatpush.bf16.msra.mxu1 %v249_v20  ;;  %262 = vmatpush.bf16.msra.mxu2 %v249_v20 }
  0x23   :  { %174 = vmatpush.bf16.msra.mxu1 %v248_v21  ;;  %263 = vmatpush.bf16.msra.mxu2 %v248_v21 }
  0x25   :  { %214 = vmatmul.msk.bf16.gmra.mxu0 %vm60_vm2, %v43_v17 }
  0x92   :  { %v83_v22 = vpop.f32.mrf.mxu0 }
  0x93   :  { %v84_v24 = vadd.f32 %v271_v23, %v83_v22 }
  0x95   :  { %v93_v27 = vmax.f32 %v84_v24, 0.0 }
  0x9a   :  { %v85_v25 = vpop.f32.mrf.mxu0 }
  0x9b   :  { %v86_v26 = vadd.f32 %v271_v23, %v85_v25 }
  0x9d   :  { %v94_v28 = vmax.f32 %v86_v26, 0.0 }
  0x9f   :  { %v97_v29 = vpack.c.bf16 %v94_v28, %v93_v27 }
  0xa1   :  { %175 = vmatmul.bf16.vlgmr.msra.gmra.mxu1 %v97_v29 }
  0xa2   :  { %v88_v30 = vpop.f32.mrf.mxu0 }
  0xa3   :  { %v89_v31 = vadd.f32 %v271_v23, %v88_v30 }
  0xa5   :  { %v95_v34 = vmax.f32 %v89_v31, 0.0 }
  0xaa   :  { %v90_v32 = vpop.f32.mrf.mxu0 }
  0xab   :  { %v91_v33 = vadd.f32 %v271_v23, %v90_v32 }
  0xad   :  { %v96_v35 = vmax.f32 %v91_v33, 0.0 }
  0xaf   :  { %v98_v36 = vpack.c.bf16 %v96_v35, %v95_v34 }
  0xb1   :  { %180 = vmatmul.bf16.vlgmr.msra.gmra.mxu2 %v98_v36 }
 0x11e   :  { %v176_v38 = vpop.f32.mrf.mxu1 }
 0x11f   :  { %v177_v39 = vadd.f32 %v272_v37, %v176_v38 }
 0x121   :  { %186 = vst [vmem:[#allocation5] sm:$0xff] %v177_v39 }
 0x126   :  { %v178_v40 = vpop.f32.mrf.mxu1 }
 0x127   :  { %v179_v41 = vadd.f32 %v272_v37, %v178_v40 }
 0x129   :  { %187 = vst [vmem:[#allocation5 + $0x8] sm:$0xff] %v179_v41 }
 0x134   :  { %v181_v42 = vpop.f32.mrf.mxu2 }
 0x135   :  { %v182_v43 = vadd.f32 %v272_v37, %v181_v42 }
 0x137   :  { %188 = vst [vmem:[#allocation5 + $0x10] sm:$0xff] %v182_v43 }
 0x13c   :  { %v183_v44 = vpop.f32.mrf.mxu2 }
 0x13d   :  { %v184_v45 = vadd.f32 %v272_v37, %v183_v44 }
 0x13f   :  { %189 = vst [vmem:[#allocation5 + $0x18] sm:$0xff] %v184_v45 }
 0x140   :  { %202 = dma.vmem_to_hbm [thread:$0]  %s195_s13, 512, %s197_s16, [#allocation4], %s330_s4, %s330_s4, %s331_s17  }
 0x141   :  { %323 = dma.done.wait [#allocation4], 512  }
 0x142   :  { %324 = vsyncadd [#allocation4], 4294966784 }
 0x143   :  { %207 = vsyncpa [#allocation3], 1 }
 0x144   :  { %208 = vsyncpa [#allocation4], 1 }

</bundles_post_ra>
